<compile_context>
chip_gen: v5e
topology: v5e:2x2
jax: 0.10.0
libtpu: 0.0.40
codegen_flags: <defaults>
</compile_context>

<pallas_src>
import functools

import jax
import jax.numpy as jnp
from jax.experimental import pallas as pl
from jax.experimental.pallas import tpu as pltpu


# ----------------------------------------------------------------------------
# Parameter setup (glue, plain JAX) — mirrors LinearSplineSlopeConstrained.__init__
# ----------------------------------------------------------------------------
def make_spline_params(num_activations, size, range_, init, smin, smax,
                       slope_constrained):
    """Deterministic re-implementation of the module's parameter init
    (uniform_grid=True).  Returns (knots, coeffs), each (num_activations, size)."""
    grid_1d = jnp.linspace(-range_, range_, size, dtype=jnp.float32)
    knots = jnp.broadcast_to(grid_1d, (num_activations, size))

    if init == "identity":
        coeffs = knots
    elif init == "relu":
        coeffs = jnp.maximum(knots, 0.0)
    elif init == "absolute_value":
        coeffs = jnp.abs(knots)
    elif init == "zero":
        coeffs = jnp.zeros_like(knots)
    elif init == "double":
        coeffs = 2.0 * knots
    else:
        raise ValueError(f"unsupported init {init!r}")

    if slope_constrained:
        coeffs = project_slopes_vectorized(coeffs, knots, smin, smax)
    return knots, coeffs


def project_slopes_vectorized(fn_values, knot_positions, smin, smax):
    """JAX port of project_slopes_vectorized (parameter preprocessing).
    Matches the PyTorch version including the *global* mean adjustment."""
    delta_f = fn_values[:, 1:] - fn_values[:, :-1]
    delta_t = knot_positions[:, 1:] - knot_positions[:, :-1]
    s = delta_f / delta_t                               # slopes[:, 1:]
    slopes = jnp.concatenate([s[:, :1], s], axis=1)     # slopes[:, 0] = slopes[:, 1]
    clipped = jnp.clip(slopes, smin, smax)
    increments = clipped[:, 1:] * delta_t
    new_fn = jnp.concatenate(
        [fn_values[:, :1], fn_values[:, :1] + jnp.cumsum(increments, axis=1)],
        axis=1)
    mean_adjustment = jnp.mean(fn_values) - jnp.mean(new_fn)
    return new_fn + mean_adjustment


# ----------------------------------------------------------------------------
# Pallas kernel: per-element linear-spline evaluation (LinearSpline_Func.forward)
# ----------------------------------------------------------------------------
def _spline_kernel(x_ref, coefs_ref, slopes_ref, out_ref, grad_ref, *,
                   size, range_, h, inv_h):
    x = x_ref[...]                 # (TN, L) f32
    coefs = coefs_ref[...]         # (S-1, L) left-endpoint coefficients c_k
    slopes = slopes_ref[...]       # (S-1, L) per-interval slopes s_k

    # Uniform-grid equivalent of torch.searchsorted(knots, x, right=False) - 1,
    # clamped to [0, size-2].  ceil(u)-1 reproduces the "strictly less than"
    # counting semantics (exact knot hits fall in the LEFT interval).
    u = (x + range_) * inv_h
    left_idx = jnp.clip(jnp.ceil(u).astype(jnp.int32) - 1, 0, size - 2)

    # Gather c_l / s_l with a short static select loop (VPU elementwise only).
    c_l = jnp.broadcast_to(coefs[0:1, :], x.shape)
    s_l = jnp.broadcast_to(slopes[0:1, :], x.shape)
    for k in range(1, size - 1):
        m = left_idx == k
        c_l = jnp.where(m, coefs[k:k + 1, :], c_l)
        s_l = jnp.where(m, slopes[k:k + 1, :], s_l)

    # t_l is exact on the uniform grid; no divisions anywhere.
    t_l = left_idx.astype(jnp.float32) * h - range_
    out_ref[...] = c_l + s_l * (x - t_l)
    grad_ref[...] = s_l


def linear_spline_forward(x, knots, coeffs, range_, *, tile_rows=512):
    """x: (N, C) fc-mode input.  knots, coeffs: (C, S) as in the PyTorch module.
    range_: positive half-range of the uniform knot grid (Python float).

    Returns (output (N, C), grad_x_temp (N, C)).  Note: PyTorch keeps
    grad_x_temp in (C, N) layout; we keep (N, C) to avoid an extra full HBM
    transpose pass — transpose at the consumer if the exact layout is needed.
    """
    orig_dtype = x.dtype
    x = x.astype(jnp.float32)
    n, c = x.shape
    s = knots.shape[1]
    h = 2.0 * float(range_) / (s - 1)
    inv_h = 1.0 / h

    knots = knots.astype(jnp.float32)
    coeffs = coeffs.astype(jnp.float32)

    # Per-interval slopes, computed exactly like the module's grad_x_temp.
    slopes = (coeffs[:, 1:] - coeffs[:, :-1]) / (knots[:, 1:] - knots[:, :-1])

    coefs_t = jnp.transpose(coeffs[:, :-1])   # (S-1, C): left endpoints only
    slopes_t = jnp.transpose(slopes)          # (S-1, C)

    # ---- lane folding: make the lane (last) dim 128-wide when possible ------
    fold = 128 // c if (c < 128 and 128 % c == 0) else 1
    n_pad = pl.cdiv(n, fold) * fold
    if n_pad != n:
        x = jnp.pad(x, ((0, n_pad - n), (0, 0)))
    rows = n_pad // fold
    lanes = fold * c
    x_f = x.reshape(rows, lanes)
    if fold > 1:
        coefs_t = jnp.tile(coefs_t, (1, fold))
        slopes_t = jnp.tile(slopes_t, (1, fold))

    # ---- row tiling: big tiles, pad the last one instead of asserting -------
    if rows <= tile_rows:
        tr = rows
        rows_pad = rows
    else:
        tr = tile_rows
        rows_pad = pl.cdiv(rows, tr) * tr
        if rows_pad != rows:
            x_f = jnp.pad(x_f, ((0, rows_pad - rows), (0, 0)))
    grid = rows_pad // tr

    kernel = functools.partial(_spline_kernel, size=s, range_=float(range_),
                               h=float(h), inv_h=float(inv_h))
    out_f, grad_f = pl.pallas_call(
        kernel,
        out_shape=(jax.ShapeDtypeStruct((rows_pad, lanes), jnp.float32),
                   jax.ShapeDtypeStruct((rows_pad, lanes), jnp.float32)),
        grid_spec=pltpu.PrefetchScalarGridSpec(
            num_scalar_prefetch=0,
            grid=(grid,),
            in_specs=[
                pl.BlockSpec((tr, lanes), lambda i: (i, 0)),       # x tile
                pl.BlockSpec((s - 1, lanes), lambda i: (0, 0)),    # coeffs (resident)
                pl.BlockSpec((s - 1, lanes), lambda i: (0, 0)),    # slopes (resident)
            ],
            out_specs=[
                pl.BlockSpec((tr, lanes), lambda i: (i, 0)),
                pl.BlockSpec((tr, lanes), lambda i: (i, 0)),
            ],
        ),
        compiler_params=pltpu.CompilerParams(
            dimension_semantics=("parallel",)),
    )(x_f, coefs_t, slopes_t)

    out = out_f.reshape(n_pad, c)[:n].astype(orig_dtype)
    grad = grad_f.reshape(n_pad, c)[:n]
    return out, grad


# ----------------------------------------------------------------------------
# Pure-JAX reference (mirrors LinearSpline_Func.forward) for verification
# ----------------------------------------------------------------------------
def reference_forward(x, knots, coeffs):
    xt = jnp.transpose(x)                                  # (C, N)
    li = jax.vmap(lambda t, v: jnp.searchsorted(t, v, side="left"))(knots, xt) - 1
    li = jnp.clip(li, 0, knots.shape[1] - 2)
    t_l = jnp.take_along_axis(knots, li, axis=1)
    t_r = jnp.take_along_axis(knots, li + 1, axis=1)
    c_l = jnp.take_along_axis(coeffs, li, axis=1)
    c_r = jnp.take_along_axis(coeffs, li + 1, axis=1)
    lb = (t_r - xt) / (t_r - t_l)
    out = c_l * lb + c_r * (1.0 - lb)
    grad = (c_r - c_l) / (t_r - t_l)
    return jnp.transpose(out), jnp.transpose(grad)


if __name__ == "__main__":
    # Module config (fc mode): num_activations = feature dim of the input.
    num_activations = 32
    size = 17
    range_ = 4.0
    smin, smax = 0.01, 1.0

    knots, coeffs = make_spline_params(
        num_activations=num_activations, size=size, range_=range_,
        init="relu", smin=smin, smax=smax, slope_constrained=True)

    # fc-mode input: (batch, num_activations); scaled to exercise extrapolation.
    batch = 64
    key = jax.random.PRNGKey(0)
    x = (jax.random.normal(key, (batch, num_activations), dtype=jnp.float32)
         * 3.0)

    out, grad = linear_spline_forward(x, knots, coeffs, range_)
    out = jax.block_until_ready(out)
    grad = jax.block_until_ready(grad)

    ref_out, ref_grad = reference_forward(x, knots, coeffs)
    assert jnp.allclose(out, ref_out, atol=1e-4, rtol=1e-5), "output mismatch"
    assert jnp.allclose(grad, ref_grad, atol=1e-5, rtol=1e-5), "grad_x_temp mismatch"

    print("KERNEL_OK")
</pallas_src>

<mosaic_0001>
module attributes {stable_mosaic.version = 11 : i64} {
  func.func @_spline_kernel(%arg0: i32, %arg1: memref<16x128xf32, #tpu.memory_space<vmem>>, %arg2: memref<16x128xf32, #tpu.memory_space<vmem>>, %arg3: memref<16x128xf32, #tpu.memory_space<vmem>>, %arg4: memref<16x128xf32, #tpu.memory_space<vmem>>, %arg5: memref<16x128xf32, #tpu.memory_space<vmem>>) attributes {dimension_semantics = [#tpu.dimension_semantics<parallel>], iteration_bounds = array<i64: 1>, scalar_prefetch = 0 : i64, scratch_operands = 0 : i64, tpu.core_type = #tpu.core_type<tc>, window_params = [{transform_indices = @transform_0, window_bounds = array<i64: 16, 128>}, {pipeline_mode = #tpu.pipeline_mode<synchronous>, transform_indices = @transform_1, window_bounds = array<i64: 16, 128>}, {pipeline_mode = #tpu.pipeline_mode<synchronous>, transform_indices = @transform_2, window_bounds = array<i64: 16, 128>}, {transform_indices = @transform_3, window_bounds = array<i64: 16, 128>}, {transform_indices = @transform_4, window_bounds = array<i64: 16, 128>}]} {
    %c0 = arith.constant 0 : index
    %c0_0 = arith.constant 0 : index
    %0 = vector.load %arg1[%c0, %c0_0] : memref<16x128xf32, #tpu.memory_space<vmem>>, vector<16x128xf32>
    %c0_1 = arith.constant 0 : index
    %c0_2 = arith.constant 0 : index
    %1 = vector.load %arg2[%c0_1, %c0_2] : memref<16x128xf32, #tpu.memory_space<vmem>>, vector<16x128xf32>
    %c0_3 = arith.constant 0 : index
    %c0_4 = arith.constant 0 : index
    %2 = vector.load %arg3[%c0_3, %c0_4] : memref<16x128xf32, #tpu.memory_space<vmem>>, vector<16x128xf32>
    %cst = arith.constant 4.000000e+00 : f32
    %3 = vector.broadcast %cst : f32 to vector<16x128xf32>
    %4 = arith.addf %0, %3 : vector<16x128xf32>
    %cst_5 = arith.constant 2.000000e+00 : f32
    %5 = vector.broadcast %cst_5 : f32 to vector<16x128xf32>
    %6 = arith.mulf %4, %5 : vector<16x128xf32>
    %7 = math.ceil %6 : vector<16x128xf32>
    %8 = arith.fptosi %7 : vector<16x128xf32> to vector<16x128xi32>
    %c1_i32 = arith.constant 1 : i32
    %9 = vector.broadcast %c1_i32 : i32 to vector<16x128xi32>
    %10 = arith.subi %8, %9 : vector<16x128xi32>
    %c0_i32 = arith.constant 0 : i32
    %c15_i32 = arith.constant 15 : i32
    %11 = vector.broadcast %c0_i32 : i32 to vector<16x128xi32>
    %12 = arith.maxsi %11, %10 : vector<16x128xi32>
    %13 = vector.broadcast %c15_i32 : i32 to vector<16x128xi32>
    %14 = arith.minsi %13, %12 : vector<16x128xi32>
    %15 = vector.extract_strided_slice %1 {offsets = [0, 0], sizes = [1, 128], strides = [1, 1]} : vector<16x128xf32> to vector<1x128xf32>
    %16 = vector.shape_cast %15 : vector<1x128xf32> to vector<1x128xf32>
    %17 = vector.broadcast %16 : vector<1x128xf32> to vector<16x128xf32>
    %18 = vector.extract_strided_slice %2 {offsets = [0, 0], sizes = [1, 128], strides = [1, 1]} : vector<16x128xf32> to vector<1x128xf32>
    %19 = vector.shape_cast %18 : vector<1x128xf32> to vector<1x128xf32>
    %20 = vector.broadcast %19 : vector<1x128xf32> to vector<16x128xf32>
    %c1_i32_6 = arith.constant 1 : i32
    %21 = vector.broadcast %c1_i32_6 : i32 to vector<16x128xi32>
    %22 = arith.cmpi eq, %14, %21 : vector<16x128xi32>
    %23 = vector.extract_strided_slice %1 {offsets = [1, 0], sizes = [1, 128], strides = [1, 1]} : vector<16x128xf32> to vector<1x128xf32>
    %24 = vector.shape_cast %23 : vector<1x128xf32> to vector<1x128xf32>
    %25 = vector.broadcast %24 : vector<1x128xf32> to vector<16x128xf32>
    %26 = arith.select %22, %25, %17 : vector<16x128xi1>, vector<16x128xf32>
    %27 = vector.extract_strided_slice %2 {offsets = [1, 0], sizes = [1, 128], strides = [1, 1]} : vector<16x128xf32> to vector<1x128xf32>
    %28 = vector.shape_cast %27 : vector<1x128xf32> to vector<1x128xf32>
    %29 = vector.broadcast %28 : vector<1x128xf32> to vector<16x128xf32>
    %30 = arith.select %22, %29, %20 : vector<16x128xi1>, vector<16x128xf32>
    %c2_i32 = arith.constant 2 : i32
    %31 = vector.broadcast %c2_i32 : i32 to vector<16x128xi32>
    %32 = arith.cmpi eq, %14, %31 : vector<16x128xi32>
    %33 = vector.extract_strided_slice %1 {offsets = [2, 0], sizes = [1, 128], strides = [1, 1]} : vector<16x128xf32> to vector<1x128xf32>
    %34 = vector.shape_cast %33 : vector<1x128xf32> to vector<1x128xf32>
    %35 = vector.broadcast %34 : vector<1x128xf32> to vector<16x128xf32>
    %36 = arith.select %32, %35, %26 : vector<16x128xi1>, vector<16x128xf32>
    %37 = vector.extract_strided_slice %2 {offsets = [2, 0], sizes = [1, 128], strides = [1, 1]} : vector<16x128xf32> to vector<1x128xf32>
    %38 = vector.shape_cast %37 : vector<1x128xf32> to vector<1x128xf32>
    %39 = vector.broadcast %38 : vector<1x128xf32> to vector<16x128xf32>
    %40 = arith.select %32, %39, %30 : vector<16x128xi1>, vector<16x128xf32>
    %c3_i32 = arith.constant 3 : i32
    %41 = vector.broadcast %c3_i32 : i32 to vector<16x128xi32>
    %42 = arith.cmpi eq, %14, %41 : vector<16x128xi32>
    %43 = vector.extract_strided_slice %1 {offsets = [3, 0], sizes = [1, 128], strides = [1, 1]} : vector<16x128xf32> to vector<1x128xf32>
    %44 = vector.shape_cast %43 : vector<1x128xf32> to vector<1x128xf32>
    %45 = vector.broadcast %44 : vector<1x128xf32> to vector<16x128xf32>
    %46 = arith.select %42, %45, %36 : vector<16x128xi1>, vector<16x128xf32>
    %47 = vector.extract_strided_slice %2 {offsets = [3, 0], sizes = [1, 128], strides = [1, 1]} : vector<16x128xf32> to vector<1x128xf32>
    %48 = vector.shape_cast %47 : vector<1x128xf32> to vector<1x128xf32>
    %49 = vector.broadcast %48 : vector<1x128xf32> to vector<16x128xf32>
    %50 = arith.select %42, %49, %40 : vector<16x128xi1>, vector<16x128xf32>
    %c4_i32 = arith.constant 4 : i32
    %51 = vector.broadcast %c4_i32 : i32 to vector<16x128xi32>
    %52 = arith.cmpi eq, %14, %51 : vector<16x128xi32>
    %53 = vector.extract_strided_slice %1 {offsets = [4, 0], sizes = [1, 128], strides = [1, 1]} : vector<16x128xf32> to vector<1x128xf32>
    %54 = vector.shape_cast %53 : vector<1x128xf32> to vector<1x128xf32>
    %55 = vector.broadcast %54 : vector<1x128xf32> to vector<16x128xf32>
    %56 = arith.select %52, %55, %46 : vector<16x128xi1>, vector<16x128xf32>
    %57 = vector.extract_strided_slice %2 {offsets = [4, 0], sizes = [1, 128], strides = [1, 1]} : vector<16x128xf32> to vector<1x128xf32>
    %58 = vector.shape_cast %57 : vector<1x128xf32> to vector<1x128xf32>
    %59 = vector.broadcast %58 : vector<1x128xf32> to vector<16x128xf32>
    %60 = arith.select %52, %59, %50 : vector<16x128xi1>, vector<16x128xf32>
    %c5_i32 = arith.constant 5 : i32
    %61 = vector.broadcast %c5_i32 : i32 to vector<16x128xi32>
    %62 = arith.cmpi eq, %14, %61 : vector<16x128xi32>
    %63 = vector.extract_strided_slice %1 {offsets = [5, 0], sizes = [1, 128], strides = [1, 1]} : vector<16x128xf32> to vector<1x128xf32>
    %64 = vector.shape_cast %63 : vector<1x128xf32> to vector<1x128xf32>
    %65 = vector.broadcast %64 : vector<1x128xf32> to vector<16x128xf32>
    %66 = arith.select %62, %65, %56 : vector<16x128xi1>, vector<16x128xf32>
    %67 = vector.extract_strided_slice %2 {offsets = [5, 0], sizes = [1, 128], strides = [1, 1]} : vector<16x128xf32> to vector<1x128xf32>
    %68 = vector.shape_cast %67 : vector<1x128xf32> to vector<1x128xf32>
    %69 = vector.broadcast %68 : vector<1x128xf32> to vector<16x128xf32>
    %70 = arith.select %62, %69, %60 : vector<16x128xi1>, vector<16x128xf32>
    %c6_i32 = arith.constant 6 : i32
    %71 = vector.broadcast %c6_i32 : i32 to vector<16x128xi32>
    %72 = arith.cmpi eq, %14, %71 : vector<16x128xi32>
    %73 = vector.extract_strided_slice %1 {offsets = [6, 0], sizes = [1, 128], strides = [1, 1]} : vector<16x128xf32> to vector<1x128xf32>
    %74 = vector.shape_cast %73 : vector<1x128xf32> to vector<1x128xf32>
    %75 = vector.broadcast %74 : vector<1x128xf32> to vector<16x128xf32>
    %76 = arith.select %72, %75, %66 : vector<16x128xi1>, vector<16x128xf32>
    %77 = vector.extract_strided_slice %2 {offsets = [6, 0], sizes = [1, 128], strides = [1, 1]} : vector<16x128xf32> to vector<1x128xf32>
    %78 = vector.shape_cast %77 : vector<1x128xf32> to vector<1x128xf32>
    %79 = vector.broadcast %78 : vector<1x128xf32> to vector<16x128xf32>
    %80 = arith.select %72, %79, %70 : vector<16x128xi1>, vector<16x128xf32>
    %c7_i32 = arith.constant 7 : i32
    %81 = vector.broadcast %c7_i32 : i32 to vector<16x128xi32>
    %82 = arith.cmpi eq, %14, %81 : vector<16x128xi32>
    %83 = vector.extract_strided_slice %1 {offsets = [7, 0], sizes = [1, 128], strides = [1, 1]} : vector<16x128xf32> to vector<1x128xf32>
    %84 = vector.shape_cast %83 : vector<1x128xf32> to vector<1x128xf32>
    %85 = vector.broadcast %84 : vector<1x128xf32> to vector<16x128xf32>
    %86 = arith.select %82, %85, %76 : vector<16x128xi1>, vector<16x128xf32>
    %87 = vector.extract_strided_slice %2 {offsets = [7, 0], sizes = [1, 128], strides = [1, 1]} : vector<16x128xf32> to vector<1x128xf32>
    %88 = vector.shape_cast %87 : vector<1x128xf32> to vector<1x128xf32>
    %89 = vector.broadcast %88 : vector<1x128xf32> to vector<16x128xf32>
    %90 = arith.select %82, %89, %80 : vector<16x128xi1>, vector<16x128xf32>
    %c8_i32 = arith.constant 8 : i32
    %91 = vector.broadcast %c8_i32 : i32 to vector<16x128xi32>
    %92 = arith.cmpi eq, %14, %91 : vector<16x128xi32>
    %93 = vector.extract_strided_slice %1 {offsets = [8, 0], sizes = [1, 128], strides = [1, 1]} : vector<16x128xf32> to vector<1x128xf32>
    %94 = vector.shape_cast %93 : vector<1x128xf32> to vector<1x128xf32>
    %95 = vector.broadcast %94 : vector<1x128xf32> to vector<16x128xf32>
    %96 = arith.select %92, %95, %86 : vector<16x128xi1>, vector<16x128xf32>
    %97 = vector.extract_strided_slice %2 {offsets = [8, 0], sizes = [1, 128], strides = [1, 1]} : vector<16x128xf32> to vector<1x128xf32>
    %98 = vector.shape_cast %97 : vector<1x128xf32> to vector<1x128xf32>
    %99 = vector.broadcast %98 : vector<1x128xf32> to vector<16x128xf32>
    %100 = arith.select %92, %99, %90 : vector<16x128xi1>, vector<16x128xf32>
    %c9_i32 = arith.constant 9 : i32
    %101 = vector.broadcast %c9_i32 : i32 to vector<16x128xi32>
    %102 = arith.cmpi eq, %14, %101 : vector<16x128xi32>
    %103 = vector.extract_strided_slice %1 {offsets = [9, 0], sizes = [1, 128], strides = [1, 1]} : vector<16x128xf32> to vector<1x128xf32>
    %104 = vector.shape_cast %103 : vector<1x128xf32> to vector<1x128xf32>
    %105 = vector.broadcast %104 : vector<1x128xf32> to vector<16x128xf32>
    %106 = arith.select %102, %105, %96 : vector<16x128xi1>, vector<16x128xf32>
    %107 = vector.extract_strided_slice %2 {offsets = [9, 0], sizes = [1, 128], strides = [1, 1]} : vector<16x128xf32> to vector<1x128xf32>
    %108 = vector.shape_cast %107 : vector<1x128xf32> to vector<1x128xf32>
    %109 = vector.broadcast %108 : vector<1x128xf32> to vector<16x128xf32>
    %110 = arith.select %102, %109, %100 : vector<16x128xi1>, vector<16x128xf32>
    %c10_i32 = arith.constant 10 : i32
    %111 = vector.broadcast %c10_i32 : i32 to vector<16x128xi32>
    %112 = arith.cmpi eq, %14, %111 : vector<16x128xi32>
    %113 = vector.extract_strided_slice %1 {offsets = [10, 0], sizes = [1, 128], strides = [1, 1]} : vector<16x128xf32> to vector<1x128xf32>
    %114 = vector.shape_cast %113 : vector<1x128xf32> to vector<1x128xf32>
    %115 = vector.broadcast %114 : vector<1x128xf32> to vector<16x128xf32>
    %116 = arith.select %112, %115, %106 : vector<16x128xi1>, vector<16x128xf32>
    %117 = vector.extract_strided_slice %2 {offsets = [10, 0], sizes = [1, 128], strides = [1, 1]} : vector<16x128xf32> to vector<1x128xf32>
    %118 = vector.shape_cast %117 : vector<1x128xf32> to vector<1x128xf32>
    %119 = vector.broadcast %118 : vector<1x128xf32> to vector<16x128xf32>
    %120 = arith.select %112, %119, %110 : vector<16x128xi1>, vector<16x128xf32>
    %c11_i32 = arith.constant 11 : i32
    %121 = vector.broadcast %c11_i32 : i32 to vector<16x128xi32>
    %122 = arith.cmpi eq, %14, %121 : vector<16x128xi32>
    %123 = vector.extract_strided_slice %1 {offsets = [11, 0], sizes = [1, 128], strides = [1, 1]} : vector<16x128xf32> to vector<1x128xf32>
    %124 = vector.shape_cast %123 : vector<1x128xf32> to vector<1x128xf32>
    %125 = vector.broadcast %124 : vector<1x128xf32> to vector<16x128xf32>
    %126 = arith.select %122, %125, %116 : vector<16x128xi1>, vector<16x128xf32>
    %127 = vector.extract_strided_slice %2 {offsets = [11, 0], sizes = [1, 128], strides = [1, 1]} : vector<16x128xf32> to vector<1x128xf32>
    %128 = vector.shape_cast %127 : vector<1x128xf32> to vector<1x128xf32>
    %129 = vector.broadcast %128 : vector<1x128xf32> to vector<16x128xf32>
    %130 = arith.select %122, %129, %120 : vector<16x128xi1>, vector<16x128xf32>
    %c12_i32 = arith.constant 12 : i32
    %131 = vector.broadcast %c12_i32 : i32 to vector<16x128xi32>
    %132 = arith.cmpi eq, %14, %131 : vector<16x128xi32>
    %133 = vector.extract_strided_slice %1 {offsets = [12, 0], sizes = [1, 128], strides = [1, 1]} : vector<16x128xf32> to vector<1x128xf32>
    %134 = vector.shape_cast %133 : vector<1x128xf32> to vector<1x128xf32>
    %135 = vector.broadcast %134 : vector<1x128xf32> to vector<16x128xf32>
    %136 = arith.select %132, %135, %126 : vector<16x128xi1>, vector<16x128xf32>
    %137 = vector.extract_strided_slice %2 {offsets = [12, 0], sizes = [1, 128], strides = [1, 1]} : vector<16x128xf32> to vector<1x128xf32>
    %138 = vector.shape_cast %137 : vector<1x128xf32> to vector<1x128xf32>
    %139 = vector.broadcast %138 : vector<1x128xf32> to vector<16x128xf32>
    %140 = arith.select %132, %139, %130 : vector<16x128xi1>, vector<16x128xf32>
    %c13_i32 = arith.constant 13 : i32
    %141 = vector.broadcast %c13_i32 : i32 to vector<16x128xi32>
    %142 = arith.cmpi eq, %14, %141 : vector<16x128xi32>
    %143 = vector.extract_strided_slice %1 {offsets = [13, 0], sizes = [1, 128], strides = [1, 1]} : vector<16x128xf32> to vector<1x128xf32>
    %144 = vector.shape_cast %143 : vector<1x128xf32> to vector<1x128xf32>
    %145 = vector.broadcast %144 : vector<1x128xf32> to vector<16x128xf32>
    %146 = arith.select %142, %145, %136 : vector<16x128xi1>, vector<16x128xf32>
    %147 = vector.extract_strided_slice %2 {offsets = [13, 0], sizes = [1, 128], strides = [1, 1]} : vector<16x128xf32> to vector<1x128xf32>
    %148 = vector.shape_cast %147 : vector<1x128xf32> to vector<1x128xf32>
    %149 = vector.broadcast %148 : vector<1x128xf32> to vector<16x128xf32>
    %150 = arith.select %142, %149, %140 : vector<16x128xi1>, vector<16x128xf32>
    %c14_i32 = arith.constant 14 : i32
    %151 = vector.broadcast %c14_i32 : i32 to vector<16x128xi32>
    %152 = arith.cmpi eq, %14, %151 : vector<16x128xi32>
    %153 = vector.extract_strided_slice %1 {offsets = [14, 0], sizes = [1, 128], strides = [1, 1]} : vector<16x128xf32> to vector<1x128xf32>
    %154 = vector.shape_cast %153 : vector<1x128xf32> to vector<1x128xf32>
    %155 = vector.broadcast %154 : vector<1x128xf32> to vector<16x128xf32>
    %156 = arith.select %152, %155, %146 : vector<16x128xi1>, vector<16x128xf32>
    %157 = vector.extract_strided_slice %2 {offsets = [14, 0], sizes = [1, 128], strides = [1, 1]} : vector<16x128xf32> to vector<1x128xf32>
    %158 = vector.shape_cast %157 : vector<1x128xf32> to vector<1x128xf32>
    %159 = vector.broadcast %158 : vector<1x128xf32> to vector<16x128xf32>
    %160 = arith.select %152, %159, %150 : vector<16x128xi1>, vector<16x128xf32>
    %c15_i32_7 = arith.constant 15 : i32
    %161 = vector.broadcast %c15_i32_7 : i32 to vector<16x128xi32>
    %162 = arith.cmpi eq, %14, %161 : vector<16x128xi32>
    %163 = vector.extract_strided_slice %1 {offsets = [15, 0], sizes = [1, 128], strides = [1, 1]} : vector<16x128xf32> to vector<1x128xf32>
    %164 = vector.shape_cast %163 : vector<1x128xf32> to vector<1x128xf32>
    %165 = vector.broadcast %164 : vector<1x128xf32> to vector<16x128xf32>
    %166 = arith.select %162, %165, %156 : vector<16x128xi1>, vector<16x128xf32>
    %167 = vector.extract_strided_slice %2 {offsets = [15, 0], sizes = [1, 128], strides = [1, 1]} : vector<16x128xf32> to vector<1x128xf32>
    %168 = vector.shape_cast %167 : vector<1x128xf32> to vector<1x128xf32>
    %169 = vector.broadcast %168 : vector<1x128xf32> to vector<16x128xf32>
    %170 = arith.select %162, %169, %160 : vector<16x128xi1>, vector<16x128xf32>
    %171 = arith.sitofp %14 : vector<16x128xi32> to vector<16x128xf32>
    %cst_8 = arith.constant 5.000000e-01 : f32
    %172 = vector.broadcast %cst_8 : f32 to vector<16x128xf32>
    %173 = arith.mulf %171, %172 : vector<16x128xf32>
    %cst_9 = arith.constant 4.000000e+00 : f32
    %174 = vector.broadcast %cst_9 : f32 to vector<16x128xf32>
    %175 = arith.subf %173, %174 : vector<16x128xf32>
    %176 = arith.subf %0, %175 : vector<16x128xf32>
    %177 = arith.mulf %170, %176 : vector<16x128xf32>
    %178 = arith.addf %166, %177 : vector<16x128xf32>
    %c0_10 = arith.constant 0 : index
    %c0_11 = arith.constant 0 : index
    %179 = vector.load %arg4[%c0_10, %c0_11] : memref<16x128xf32, #tpu.memory_space<vmem>>, vector<16x128xf32>
    tpu.vector_store %arg4[%c0_10, %c0_11], %178 {strides = array<i32>} : memref<16x128xf32, #tpu.memory_space<vmem>>, vector<16x128xf32>,
    %c0_12 = arith.constant 0 : index
    %c0_13 = arith.constant 0 : index
    %180 = vector.load %arg5[%c0_12, %c0_13] : memref<16x128xf32, #tpu.memory_space<vmem>>, vector<16x128xf32>
    tpu.vector_store %arg5[%c0_12, %c0_13], %170 {strides = array<i32>} : memref<16x128xf32, #tpu.memory_space<vmem>>, vector<16x128xf32>,
    return
  }
  func.func @transform_0(%arg0: i32) -> (i32, i32) {
    %c0_i32 = arith.constant 0 : i32
    %c0_i32_0 = arith.constant 0 : i32
    return %arg0, %c0_i32 : i32, i32
  }
  func.func @transform_1(%arg0: i32) -> (i32, i32) {
    %c0_i32 = arith.constant 0 : i32
    %c0_i32_0 = arith.constant 0 : i32
    %c0_i32_1 = arith.constant 0 : i32
    return %c0_i32, %c0_i32_0 : i32, i32
  }
  func.func @transform_2(%arg0: i32) -> (i32, i32) {
    %c0_i32 = arith.constant 0 : i32
    %c0_i32_0 = arith.constant 0 : i32
    %c0_i32_1 = arith.constant 0 : i32
    return %c0_i32, %c0_i32_0 : i32, i32
  }
  func.func @transform_3(%arg0: i32) -> (i32, i32) {
    %c0_i32 = arith.constant 0 : i32
    %c0_i32_0 = arith.constant 0 : i32
    return %arg0, %c0_i32 : i32, i32
  }
  func.func @transform_4(%arg0: i32) -> (i32, i32) {
    %c0_i32 = arith.constant 0 : i32
    %c0_i32_0 = arith.constant 0 : i32
    return %arg0, %c0_i32 : i32, i32
  }
}

</mosaic_0001>

<bundles_post_ra>
// kernel: tpu_custom_call.1
= control target key start
LH: loop header
LB: loop body
LE: loop exit
PB: predicated region body
PF: predicated region fallthrough
CT: control target
= control target key end

     0   :  { %10 = vsyncpa [#allocation3], 0  ;;  %s664_s0 = inlined_call_operand.hbm [shape: f32[16,128], index: 0, kind: input, shape index: {}]   ;;  %s665_s1 = inlined_call_operand.hbm [shape: f32[16,128], index: 1, kind: input, shape index: {}]   ;;  %s666_s2 = inlined_call_operand.hbm [shape: f32[16,128], index: 2, kind: input, shape index: {}]   ;;  %s667_s3 = inlined_call_operand.hbm [shape: f32[16,128], index: 3, kind: output, shape index: {0}]   ;;  %s668_s4 = inlined_call_operand.hbm [shape: f32[16,128], index: 4, kind: output, shape index: {1}]  }
   0x1   :  { %11 = vsyncpa [#allocation6], 0 }
   0x2   :  { %12 = vsyncpa [#allocation4], 0 }
   0x3   :  { %13 = vsyncpa [#allocation10], 0  ;;  %s31_s17 = sshll.u32 %s665_s1, 4  ;;  %s408_s18 = smov [#allocation5]   ;;  %s32_s17 = int_to_ptr.hbm [resolvable:$true] %s31_s17 }
   0x4   :  { %s33_s19 = sshll.u32 %s408_s18, 4  ;;  %s18_s22 = sshll.u32 %s664_s0, 4  ;;  %s34_s19 = int_to_ptr.vmem [resolvable:$true] %s33_s19  ;;  %s19_s22 = int_to_ptr.hbm [resolvable:$true] %s18_s22 }
   0x5   :  { %s409_s23 = smov 128   ;;  %s410_s24 = smov 8  }
   0x6   :  { %39 = dma.hbm_to_vmem [thread:$0]  %s32_s17, 256, %s34_s19, [#allocation6], %s409_s23, %s409_s23, %s410_s24  }
   0x7   :  { %s411_s25 = smov [#allocation2]   ;;  %s44_s1 = sshll.u32 %s666_s2, 4  ;;  %s45_s1 = int_to_ptr.hbm [resolvable:$true] %s44_s1 }
   0x8   :  { %s20_s26 = sshll.u32 %s411_s25, 4  ;;  %s412_s0 = smov [#allocation7]   ;;  %s21_s26 = int_to_ptr.vmem [resolvable:$true] %s20_s26 }
   0x9   :  { %26 = dma.hbm_to_vmem [thread:$0]  %s19_s22, 256, %s21_s26, [#allocation3], %s409_s23, %s409_s23, %s410_s24  }
   0xa   :  { %s46_s29 = sshll.u32 %s412_s0, 4  ;;  %s47_s29 = int_to_ptr.vmem [resolvable:$true] %s46_s29 }
   0xb   :  { %52 = dma.hbm_to_vmem [thread:$0]  %s45_s1, 256, %s47_s29, [#allocation6], %s409_s23, %s409_s23, %s410_s24  }
   0xc   :  { %400 = dma.done.wait [#allocation3], 256  }
   0xd   :  { %401 = vsyncadd [#allocation3], 4294967040 }
   0xe   :  { %402 = dma.done.wait [#allocation6], 512  }
   0xf   :  { %403 = vsyncadd [#allocation6], 4294966784  ;;  %v458_v0 = vld [vmem:[#allocation2] sm:$0xff]  ;;  %v461_v2 = vld [vmem:[#allocation5] sm:$0xff]  ;;  %s413_s2 = smov [#allocation9]   ;;  %s246_s7 = sshll.u32 %s668_s4, 4  ;;  %s247_s7 = int_to_ptr.hbm [resolvable:$true] %s246_s7 }
  0x10   :  { %v71_v1 = vadd.f32 4.0, %v458_v0  ;;  %v463_v3 = vld [vmem:[#allocation7] sm:$0xff]  ;;  %v89_v6 = vperm.slane %v461_v2, 0  ;;  %v93_v8 = vperm.slane %v461_v2, 1  ;;  %v101_v9 = vperm.slane %v461_v2, 2  ;;  %v469_v10 = vld [vmem:[#allocation5 + $0x8] sm:$0xff] }
  0x11   :  { %v90_v7 = vperm.slane %v463_v3, 0  ;;  %v96_v12 = vperm.slane %v463_v3, 1  ;;  %v104_v13 = vperm.slane %v463_v3, 2  ;;  %v109_v14 = vperm.slane %v461_v2, 3  ;;  %v474_v15 = vld [vmem:[#allocation2 + $0x8] sm:$0xff]  ;;  %s244_s30 = sshll.u32 %s413_s2, 4  ;;  %s245_s30 = int_to_ptr.vmem [resolvable:$true] %s244_s30 }
  0x12   :  { %v73_v4 = vmul.f32 2.0, %v71_v1  ;;  %v476_v16 = vld [vmem:[#allocation7 + $0x8] sm:$0xff]  ;;  %v112_v17 = vperm.slane %v463_v3, 3  ;;  %v117_v18 = vperm.slane %v461_v2, 4  ;;  %v120_v19 = vperm.slane %v463_v3, 4  ;;  %s414_s4 = smov [#allocation8]  }
  0x13   :  { %v125_v20 = vperm.slane %v461_v2, 5  ;;  %v128_v22 = vperm.slane %v463_v3, 5  ;;  %v133_v23 = vperm.slane %v461_v2, 6  ;;  %v136_v24 = vperm.slane %v463_v3, 6  ;;  %s231_s8 = sshll.u32 %s414_s4, 4  ;;  %s233_s11 = sshll.u32 %s667_s3, 4  ;;  %s232_s8 = int_to_ptr.vmem [resolvable:$true] %s231_s8  ;;  %s234_s11 = int_to_ptr.hbm [resolvable:$true] %s233_s11 }
  0x14   :  { %v75_v5 = vceil.f32 %v73_v4  ;;  %v141_v25 = vperm.slane %v461_v2, 7  ;;  %v144_v26 = vperm.slane %v463_v3, 7  ;;  %v149_v27 = vperm.slane %v469_v10, 0 }
  0x15   :  { %v72_v28 = vadd.f32 4.0, %v474_v15  ;;  %v152_v29 = vperm.slane %v476_v16, 0  ;;  %v157_v30 = vperm.slane %v469_v10, 1  ;;  %v160_v31 = vperm.slane %v476_v16, 1 }
  0x16   :  { %v270_v11 = vcvt.f32.s32 %v75_v5  ;;  %v165_v33 = vperm.slane %v469_v10, 2  ;;  %v168_v34 = vperm.slane %v476_v16, 2  ;;  %v173_v35 = vperm.slane %v469_v10, 3 }
  0x17   :  { %v176_v36 = vperm.slane %v476_v16, 3  ;;  %v181_v37 = vperm.slane %v469_v10, 4  ;;  %v184_v38 = vperm.slane %v476_v16, 4  ;;  %v189_v40 = vperm.slane %v469_v10, 5 }
  0x18   :  { %v265_v21 = vadd.s32 4294967295, %v270_v11  ;;  %v192_v41 = vperm.slane %v476_v16, 5  ;;  %v74_v42 = vmul.f32 2.0, %v72_v28  ;;  %v197_v43 = vperm.slane %v469_v10, 6 }
  0x19   :  { %v200_v46 = vperm.slane %v476_v16, 6  ;;  %v205_v49 = vperm.slane %v469_v10, 7  ;;  %v208_v55 = vperm.slane %v476_v16, 7 }
  0x1a   :  { %vm81_vm0 = vcmp.gt.s32.totalorder %v265_v21, 0  ;;  %v76_v52 = vceil.f32 %v74_v42 }
  0x1b   :  { %v82_v32 = vsel %vm81_vm0, %v265_v21, 0 }
  0x1c   :  { %vm85_vm1 = vcmp.lt.s32.totalorder %v82_v32, 15  ;;  %v272_v63 = vcvt.f32.s32 %v76_v52 }
  0x1d   :  { %v498_v39 = vsel %vm85_vm1, %v82_v32, 15 }
  0x1e   :  { %vm91_vm2 = vcmp.eq.s32.totalorder %v498_v39, 1  ;;  %vm99_vm3 = vcmp.eq.s32.totalorder %v498_v39, 2  ;;  %vm107_vm4 = vcmp.eq.s32.totalorder %v498_v39, 3  ;;  %vm115_vm5 = vcmp.eq.s32.totalorder %v498_v39, 4 }
  0x1f   :  { %v94_v44 = vsel %vm91_vm2, %v93_v8, %v89_v6  ;;  %v97_v45 = vsel %vm91_vm2, %v96_v12, %v90_v7  ;;  %vm123_vm6 = vcmp.eq.s32.totalorder %v498_v39, 5  ;;  %vm131_vm7 = vcmp.eq.s32.totalorder %v498_v39, 6 }
  0x20   :  { %v102_v47 = vsel %vm99_vm3, %v101_v9, %v94_v44  ;;  %v105_v48 = vsel %vm99_vm3, %v104_v13, %v97_v45  ;;  %vm139_vm8 = vcmp.eq.s32.totalorder %v498_v39, 7  ;;  %vm147_vm9 = vcmp.eq.s32.totalorder %v498_v39, 8 }
  0x21   :  { %v110_v50 = vsel %vm107_vm4, %v109_v14, %v102_v47  ;;  %v113_v51 = vsel %vm107_vm4, %v112_v17, %v105_v48  ;;  %vm155_vm10 = vcmp.eq.s32.totalorder %v498_v39, 9  ;;  %vm163_vm11 = vcmp.eq.s32.totalorder %v498_v39, 10 }
  0x22   :  { %v118_v53 = vsel %vm115_vm5, %v117_v18, %v110_v50  ;;  %v121_v54 = vsel %vm115_vm5, %v120_v19, %v113_v51  ;;  %v211_v60 = vcvt.s32.f32 %v498_v39  ;;  %vm171_vm12 = vcmp.eq.s32.totalorder %v498_v39, 11 }
  0x23   :  { %v126_v56 = vsel %vm123_vm6, %v125_v20, %v118_v53  ;;  %v129_v57 = vsel %vm123_vm6, %v128_v22, %v121_v54  ;;  %vm179_vm13 = vcmp.eq.s32.totalorder %v498_v39, 12  ;;  %vm187_vm14 = vcmp.eq.s32.totalorder %v498_v39, 13 }
  0x24   :  { %v134_v58 = vsel %vm131_vm7, %v133_v23, %v126_v56  ;;  %v137_v59 = vsel %vm131_vm7, %v136_v24, %v129_v57  ;;  %v213_v5 = vmul.f32 0.5, %v211_v60  ;;  %v266_v28 = vadd.s32 4294967295, %v272_v63 }
  0x25   :  { %v142_v61 = vsel %vm139_vm8, %v141_v25, %v134_v58  ;;  %v145_v62 = vsel %vm139_vm8, %v144_v26, %v137_v59  ;;  %vm195_vm15 = vcmp.eq.s32.totalorder %v498_v39, 14  ;;  %vm203_vm0 = vcmp.eq.s32.totalorder %v498_v39, 15 }
  0x26   :  { %v150_v1 = vsel %vm147_vm9, %v149_v27, %v142_v61  ;;  %v153_v4 = vsel %vm147_vm9, %v152_v29, %v145_v62  ;;  %v267_v44 = vadd.f32 -4.0, %v213_v5  ;;  %vm83_vm1 = vcmp.gt.s32.totalorder %v266_v28, 0 }
  0x27   :  { %v158_v11 = vsel %vm155_vm10, %v157_v30, %v150_v1  ;;  %v161_v21 = vsel %vm155_vm10, %v160_v31, %v153_v4  ;;  %v84_v52 = vsel %vm83_vm1, %v266_v28, 0 }
  0x28   :  { %v166_v32 = vsel %vm163_vm11, %v165_v33, %v158_v11  ;;  %v169_v42 = vsel %vm163_vm11, %v168_v34, %v161_v21  ;;  %v217_v51 = vsub.f32 %v458_v0, %v267_v44  ;;  %vm87_vm2 = vcmp.lt.s32.totalorder %v84_v52, 15 }
  0x29   :  { %v174_v45 = vsel %vm171_vm12, %v173_v35, %v166_v32  ;;  %v177_v47 = vsel %vm171_vm12, %v176_v36, %v169_v42  ;;  %v88_v57 = vsel %vm87_vm2, %v84_v52, 15 }
  0x2a   :  { %v182_v48 = vsel %vm179_vm13, %v181_v37, %v174_v45  ;;  %v185_v50 = vsel %vm179_vm13, %v184_v38, %v177_v47  ;;  %vm92_vm3 = vcmp.eq.s32.totalorder %v88_v57, 1  ;;  %vm100_vm4 = vcmp.eq.s32.totalorder %v88_v57, 2 }
  0x2b   :  { %v190_v53 = vsel %vm187_vm14, %v189_v40, %v182_v48  ;;  %v193_v54 = vsel %vm187_vm14, %v192_v41, %v185_v50  ;;  %v95_v60 = vsel %vm92_vm3, %v93_v8, %v89_v6  ;;  %v98_v61 = vsel %vm92_vm3, %v96_v12, %v90_v7 }
  0x2c   :  { %v198_v39 = vsel %vm195_vm15, %v197_v43, %v190_v53  ;;  %v201_v56 = vsel %vm195_vm15, %v200_v46, %v193_v54  ;;  %vm108_vm5 = vcmp.eq.s32.totalorder %v88_v57, 3  ;;  %v103_v62 = vsel %vm100_vm4, %v101_v9, %v95_v60 }
  0x2d   :  { %v206_v58 = vsel %vm203_vm0, %v205_v49, %v198_v39  ;;  %v209_v0 = vsel %vm203_vm0, %v208_v55, %v201_v56  ;;  %v106_v63 = vsel %vm100_vm4, %v104_v13, %v98_v61  ;;  %vm116_vm6 = vcmp.eq.s32.totalorder %v88_v57, 4 }
  0x2e   :  { %v219_v59 = vmul.f32 %v217_v51, %v209_v0  ;;  %225 = vst [vmem:[#allocation9] sm:$0xff] %v209_v0  ;;  %vm124_vm7 = vcmp.eq.s32.totalorder %v88_v57, 5  ;;  %v111_v4 = vsel %vm108_vm5, %v109_v14, %v103_v62  ;;  %v114_v6 = vsel %vm108_vm5, %v112_v17, %v106_v63 }
  0x2f   :  { %vm132_vm8 = vcmp.eq.s32.totalorder %v88_v57, 6  ;;  %v119_v7 = vsel %vm116_vm6, %v117_v18, %v111_v4  ;;  %v122_v8 = vsel %vm116_vm6, %v120_v19, %v114_v6  ;;  %vm140_vm9 = vcmp.eq.s32.totalorder %v88_v57, 7 }
  0x30   :  { %v221_v1 = vadd.f32 %v219_v59, %v206_v58  ;;  %v127_v9 = vsel %vm124_vm7, %v125_v20, %v119_v7  ;;  %v130_v12 = vsel %vm124_vm7, %v128_v22, %v122_v8  ;;  %vm148_vm10 = vcmp.eq.s32.totalorder %v88_v57, 8 }
  0x31   :  { %v135_v13 = vsel %vm132_vm8, %v133_v23, %v127_v9  ;;  %v138_v14 = vsel %vm132_vm8, %v136_v24, %v130_v12  ;;  %vm156_vm11 = vcmp.eq.s32.totalorder %v88_v57, 9  ;;  %vm164_vm12 = vcmp.eq.s32.totalorder %v88_v57, 10 }
  0x32   :  { %223 = vst [vmem:[#allocation8] sm:$0xff] %v221_v1  ;;  %v143_v17 = vsel %vm140_vm9, %v141_v25, %v135_v13  ;;  %v146_v18 = vsel %vm140_vm9, %v144_v26, %v138_v14  ;;  %vm172_vm13 = vcmp.eq.s32.totalorder %v88_v57, 11  ;;  %v212_v22 = vcvt.s32.f32 %v88_v57 }
  0x33   :  { %v151_v19 = vsel %vm148_vm10, %v149_v27, %v143_v17  ;;  %v154_v20 = vsel %vm148_vm10, %v152_v29, %v146_v18  ;;  %vm180_vm14 = vcmp.eq.s32.totalorder %v88_v57, 12  ;;  %vm188_vm15 = vcmp.eq.s32.totalorder %v88_v57, 13 }
  0x34   :  { %v159_v23 = vsel %vm156_vm11, %v157_v30, %v151_v19  ;;  %v162_v24 = vsel %vm156_vm11, %v160_v31, %v154_v20  ;;  %v214_v25 = vmul.f32 0.5, %v212_v22  ;;  %vm196_vm0 = vcmp.eq.s32.totalorder %v88_v57, 14 }
  0x35   :  { %v167_v2 = vsel %vm164_vm12, %v165_v33, %v159_v23  ;;  %v170_v3 = vsel %vm164_vm12, %v168_v34, %v162_v24  ;;  %vm204_vm1 = vcmp.eq.s32.totalorder %v88_v57, 15 }
  0x36   :  { %v175_v26 = vsel %vm172_vm13, %v173_v35, %v167_v2  ;;  %v178_v27 = vsel %vm172_vm13, %v176_v36, %v170_v3  ;;  %v268_v31 = vadd.f32 -4.0, %v214_v25 }
  0x37   :  { %v183_v29 = vsel %vm180_vm14, %v181_v37, %v175_v26  ;;  %v186_v30 = vsel %vm180_vm14, %v184_v38, %v178_v27 }
  0x38   :  { %v191_v33 = vsel %vm188_vm15, %v189_v40, %v183_v29  ;;  %v194_v34 = vsel %vm188_vm15, %v192_v41, %v186_v30  ;;  %v218_v5 = vsub.f32 %v474_v15, %v268_v31 }
  0x39   :  { %v199_v35 = vsel %vm196_vm0, %v197_v43, %v191_v33  ;;  %v202_v36 = vsel %vm196_vm0, %v200_v46, %v194_v34 }
  0x3a   :  { %v207_v37 = vsel %vm204_vm1, %v205_v49, %v199_v35  ;;  %v210_v38 = vsel %vm204_vm1, %v208_v55, %v202_v36 }
  0x3b   :  { %v220_v40 = vmul.f32 %v218_v5, %v210_v38  ;;  %226 = vst [vmem:[#allocation9 + $0x8] sm:$0xff] %v210_v38 }
  0x3c   :  { %252 = dma.vmem_to_hbm [thread:$0]  %s245_s30, 256, %s247_s7, [#allocation10], %s409_s23, %s409_s23, %s410_s24  }
  0x3d   :  { %v222_v15 = vadd.f32 %v220_v40, %v207_v37 }
  0x3f   :  { %224 = vst [vmem:[#allocation8 + $0x8] sm:$0xff] %v222_v15 }
  0x40   :  { %239 = dma.vmem_to_hbm [thread:$0]  %s232_s8, 256, %s234_s11, [#allocation4], %s409_s23, %s409_s23, %s410_s24  }
  0x41   :  { %404 = dma.done.wait [#allocation4], 256  }
  0x42   :  { %405 = vsyncadd [#allocation4], 4294967040 }
  0x43   :  { %406 = dma.done.wait [#allocation10], 256  }
  0x44   :  { %407 = vsyncadd [#allocation10], 4294967040 }
  0x45   :  { %261 = vsyncpa [#allocation3], 1 }
  0x46   :  { %262 = vsyncpa [#allocation6], 1 }
  0x47   :  { %263 = vsyncpa [#allocation4], 1 }
  0x48   :  { %264 = vsyncpa [#allocation10], 1 }

</bundles_post_ra>
